<compile_context>
chip_gen: v7x
topology: tpu7x:2x2x1
jax: 0.10.0
libtpu: 0.0.40
codegen_flags: <defaults>
</compile_context>

<pallas_src>
import jax
import jax.numpy as jnp
from jax.experimental import pallas as pl
from jax.experimental.pallas import tpu as pltpu

LANE = 128  # TPU lane width


def _round_up(n, m):
    return ((n + m - 1) // m) * m


def _cdiv(a, b):
    return (a + b - 1) // b


def _sigmoid_f32(z):
    # sigmoid(z) == 0.5 * tanh(0.5 * z) + 0.5 : a single EUP transcendental.
    return 0.5 * jnp.tanh(0.5 * z) + 0.5


def mlp_kernel(x_ref,
               w1_ref, b1_ref,
               w2_ref, b2_ref,
               w3_ref, b3_ref,
               w4_ref, b4_ref,
               o_ref):
    """Whole forward pass fused: 4x (bf16 matmul -> f32 acc -> +bias -> sigmoid)."""
    def layer(h_bf16, w_ref, b_ref):
        z = jnp.dot(h_bf16, w_ref[...],
                    preferred_element_type=jnp.float32) + b_ref[...]
        return _sigmoid_f32(z)

    # In-kernel f32 -> bf16 cast of x rides a free VPU slot under the MXU.
    h = layer(x_ref[...].astype(jnp.bfloat16), w1_ref, b1_ref)
    h = layer(h.astype(jnp.bfloat16), w2_ref, b2_ref)
    h = layer(h.astype(jnp.bfloat16), w3_ref, b3_ref)
    h = layer(h.astype(jnp.bfloat16), w4_ref, b4_ref)
    # Store only the real output column(s): 128x less output HBM traffic.
    o_ref[...] = h[:, :o_ref.shape[1]].astype(o_ref.dtype)


def _pad_params(params):
    """Zero-pad output feature dims to multiples of 128; weights -> bf16,
    biases -> f32.  Weights are [in, out] (transposed vs torch.nn.Linear).
    Layer-1 contraction dim (in_dim=300) is left UNPADDED (review: v5e).
    Padded rows/cols are exactly zero, so padded hidden lanes (= sigmoid(0)=0.5)
    are multiplied by zero weight rows in the next layer and contribute nothing.
    """
    padded = []
    for li, (w, b) in enumerate(params):
        fi, fo = w.shape
        fi_pad = fi if li == 0 else _round_up(fi, LANE)
        fo_pad = _round_up(fo, LANE)
        wp = jnp.zeros((fi_pad, fo_pad), jnp.bfloat16).at[:fi, :fo].set(
            w.astype(jnp.bfloat16))
        bp = jnp.zeros((1, fo_pad), jnp.float32).at[:, :fo].set(
            b.astype(jnp.float32))
        padded.append((wp, bp))
    return padded


def _choose_tiling(B, tb):
    """Balanced batch tiles: minimal padding, even (>=2) step count when B>8
    so v7x megacore sharding splits the grid evenly.  tb_eff <= tb + 7."""
    b8 = _round_up(max(B, 8), 8)
    n_steps = max(1, _cdiv(b8, _round_up(tb, 8)))
    if n_steps % 2 == 1 and b8 > 8:
        n_steps += 1
    tb_eff = _round_up(_cdiv(b8, n_steps), 8)
    b_pad = n_steps * tb_eff
    return tb_eff, b_pad, n_steps


def mlp_forward(x, params, *, tb=2048):
    """x: [B, in_dim] f32.  Returns [B, 1] f32 (sigmoid output)."""
    B, in_dim = x.shape
    out_dim = params[-1][0].shape[1]          # 1

    padded_params = _pad_params(params)
    tb_eff, b_pad, n_steps = _choose_tiling(B, tb)

    # Only pad the batch by the handful of rows needed to tile evenly.
    if b_pad != B:
        xp = jnp.zeros((b_pad, in_dim), x.dtype).at[:B].set(x)
    else:
        xp = x

    # x tiled over the batch; last block dim == full array dim (300) so the
    # (8,128) BlockSpec rule is satisfied without padding K.
    in_specs = [pl.BlockSpec((tb_eff, in_dim), lambda i: (i, 0))]
    operands = [xp]
    for (wp, bp) in padded_params:
        # Constant block index -> weights/biases DMA'd once, VMEM-resident.
        in_specs.append(pl.BlockSpec(wp.shape, lambda i: (0, 0)))
        in_specs.append(pl.BlockSpec(bp.shape, lambda i: (0, 0)))
        operands.extend([wp, bp])

    out_specs = pl.BlockSpec((tb_eff, out_dim), lambda i: (i, 0))

    flops = 2 * b_pad * sum(wp.shape[0] * wp.shape[1] for wp, _ in padded_params)
    transcendentals = b_pad * sum(wp.shape[1] for wp, _ in padded_params)
    bytes_accessed = (xp.size * 4                                   # f32 x read
                      + b_pad * out_dim * 4                         # f32 out write
                      + sum(wp.size * 2 + bp.size * 4
                            for wp, bp in padded_params))           # params

    out_padded = pl.pallas_call(
        mlp_kernel,
        out_shape=jax.ShapeDtypeStruct((b_pad, out_dim), jnp.float32),
        grid=(n_steps,),
        in_specs=in_specs,
        out_specs=out_specs,
        compiler_params=pltpu.CompilerParams(
            dimension_semantics=("parallel",)),
        cost_estimate=pl.CostEstimate(
            flops=flops,
            transcendentals=transcendentals,
            bytes_accessed=bytes_accessed),
    )(*operands)

    return out_padded[:B] if b_pad != B else out_padded


def init_params(key, input_nodes=300, layer1=20, layer2=10, layer3=4, layer_out=1):
    """Mirrors the PyTorch module: weights ~ N(0, 0.01); biases keep the
    torch.nn.Linear default U(-1/sqrt(fan_in), 1/sqrt(fan_in)).
    Weights stored as [in, out] (transposed vs torch.nn.Linear)."""
    dims = [(input_nodes, layer1), (layer1, layer2),
            (layer2, layer3), (layer3, layer_out)]
    params = []
    for (fan_in, fan_out) in dims:
        key, kw, kb = jax.random.split(key, 3)
        w = 0.01 * jax.random.normal(kw, (fan_in, fan_out), dtype=jnp.float32)
        bound = 1.0 / (fan_in ** 0.5)
        b = jax.random.uniform(kb, (1, fan_out), minval=-bound, maxval=bound,
                               dtype=jnp.float32)
        params.append((w, b))
    return params


def reference_forward(x, params):
    """Pure-JAX reference with the same bf16-operand / f32-accumulate contract."""
    h = x
    for (w, b) in params:
        z = jnp.dot(h.astype(jnp.bfloat16), w.astype(jnp.bfloat16),
                    preferred_element_type=jnp.float32) + b
        h = 1.0 / (1.0 + jnp.exp(-z))
    return h


if __name__ == "__main__":
    key = jax.random.PRNGKey(0)
    key, kx = jax.random.split(key)

    B, IN = 8, 300
    params = init_params(key, input_nodes=IN, layer1=20, layer2=10, layer3=4)

    # Small-batch check (single grid step, no batch padding).
    x = jax.random.normal(kx, (B, IN), dtype=jnp.float32)
    out = jax.block_until_ready(mlp_forward(x, params))
    ref = reference_forward(x, params)
    assert out.shape == (B, 1), out.shape
    assert jnp.allclose(out, ref, atol=5e-3, rtol=5e-3), \
        "mismatch vs reference (small batch)"

    # Multi-tile check with the default tile: B=1200 -> 2 balanced steps of 600
    # rows (even grid -> megacore-friendly on v7x, zero wasted rows).
    B2 = 1200
    x2 = jax.random.normal(jax.random.PRNGKey(1), (B2, IN), dtype=jnp.float32)
    out2 = jax.block_until_ready(mlp_forward(x2, params))
    ref2 = reference_forward(x2, params)
    assert out2.shape == (B2, 1), out2.shape
    assert jnp.allclose(out2, ref2, atol=5e-3, rtol=5e-3), \
        "mismatch vs reference (balanced 2-step grid)"

    # Multi-tile check with a smaller requested tile: 4 steps of 304 rows
    # (exercises the minimal batch-padding path, b_pad=1216 -> slice back).
    out3 = jax.block_until_ready(mlp_forward(x2, params, tb=512))
    assert out3.shape == (B2, 1), out3.shape
    assert jnp.allclose(out3, ref2, atol=5e-3, rtol=5e-3), \
        "mismatch vs reference (4-step padded grid)"

    print("KERNEL_OK")
</pallas_src>

<mosaic_0001>
module attributes {stable_mosaic.version = 11 : i64} {
  func.func @mlp_kernel(%arg0: i32, %arg1: memref<8x300xf32, #tpu.memory_space<vmem>>, %arg2: memref<300x128xbf16, #tpu.memory_space<vmem>>, %arg3: memref<1x128xf32, #tpu.memory_space<vmem>>, %arg4: memref<128x128xbf16, #tpu.memory_space<vmem>>, %arg5: memref<1x128xf32, #tpu.memory_space<vmem>>, %arg6: memref<128x128xbf16, #tpu.memory_space<vmem>>, %arg7: memref<1x128xf32, #tpu.memory_space<vmem>>, %arg8: memref<128x128xbf16, #tpu.memory_space<vmem>>, %arg9: memref<1x128xf32, #tpu.memory_space<vmem>>, %arg10: memref<8x1xf32, #tpu.memory_space<vmem>>) attributes {dimension_semantics = [#tpu.dimension_semantics<parallel>], iteration_bounds = array<i64: 1>, scalar_prefetch = 0 : i64, scratch_operands = 0 : i64, tpu.core_type = #tpu.core_type<tc>, window_params = [{transform_indices = @transform_0, window_bounds = array<i64: 8, 300>}, {pipeline_mode = #tpu.pipeline_mode<synchronous>, transform_indices = @transform_1, window_bounds = array<i64: 300, 128>}, {pipeline_mode = #tpu.pipeline_mode<synchronous>, transform_indices = @transform_2, window_bounds = array<i64: 1, 128>}, {pipeline_mode = #tpu.pipeline_mode<synchronous>, transform_indices = @transform_3, window_bounds = array<i64: 128, 128>}, {pipeline_mode = #tpu.pipeline_mode<synchronous>, transform_indices = @transform_4, window_bounds = array<i64: 1, 128>}, {pipeline_mode = #tpu.pipeline_mode<synchronous>, transform_indices = @transform_5, window_bounds = array<i64: 128, 128>}, {pipeline_mode = #tpu.pipeline_mode<synchronous>, transform_indices = @transform_6, window_bounds = array<i64: 1, 128>}, {pipeline_mode = #tpu.pipeline_mode<synchronous>, transform_indices = @transform_7, window_bounds = array<i64: 128, 128>}, {pipeline_mode = #tpu.pipeline_mode<synchronous>, transform_indices = @transform_8, window_bounds = array<i64: 1, 128>}, {transform_indices = @transform_9, window_bounds = array<i64: 8, 1>}]} {
    %c0 = arith.constant 0 : index
    %c0_0 = arith.constant 0 : index
    %0 = vector.load %arg1[%c0, %c0_0] : memref<8x300xf32, #tpu.memory_space<vmem>>, vector<8x300xf32>
    %1 = arith.truncf %0 : vector<8x300xf32> to vector<8x300xbf16>
    %c0_1 = arith.constant 0 : index
    %c0_2 = arith.constant 0 : index
    %2 = vector.load %arg2[%c0_1, %c0_2] : memref<300x128xbf16, #tpu.memory_space<vmem>>, vector<300x128xbf16>
    %cst = arith.constant dense<0.000000e+00> : vector<8x128xf32>
    %3 = tpu.matmul %1, %2, %cst {dimension_numbers = #tpu.dot_dimension_numbers<[1], [0], [0], [1], [0, 0, 1, 1], [], []>} : vector<8x300xbf16>, vector<300x128xbf16>, vector<8x128xf32> -> vector<8x128xf32>
    %c0_3 = arith.constant 0 : index
    %c0_4 = arith.constant 0 : index
    %4 = vector.load %arg3[%c0_3, %c0_4] : memref<1x128xf32, #tpu.memory_space<vmem>>, vector<1x128xf32>
    %5 = vector.broadcast %4 : vector<1x128xf32> to vector<8x128xf32>
    %6 = arith.addf %3, %5 : vector<8x128xf32>
    %cst_5 = arith.constant 5.000000e-01 : f32
    %7 = vector.broadcast %cst_5 : f32 to vector<8x128xf32>
    %8 = arith.mulf %7, %6 : vector<8x128xf32>
    %9 = math.tanh %8 : vector<8x128xf32>
    %cst_6 = arith.constant 5.000000e-01 : f32
    %10 = vector.broadcast %cst_6 : f32 to vector<8x128xf32>
    %11 = arith.mulf %10, %9 : vector<8x128xf32>
    %cst_7 = arith.constant 5.000000e-01 : f32
    %12 = vector.broadcast %cst_7 : f32 to vector<8x128xf32>
    %13 = arith.addf %11, %12 : vector<8x128xf32>
    %14 = arith.truncf %13 : vector<8x128xf32> to vector<8x128xbf16>
    %c0_8 = arith.constant 0 : index
    %c0_9 = arith.constant 0 : index
    %15 = vector.load %arg4[%c0_8, %c0_9] : memref<128x128xbf16, #tpu.memory_space<vmem>>, vector<128x128xbf16>
    %cst_10 = arith.constant dense<0.000000e+00> : vector<8x128xf32>
    %16 = tpu.matmul %14, %15, %cst_10 {dimension_numbers = #tpu.dot_dimension_numbers<[1], [0], [0], [1], [0, 0, 1, 1], [], []>} : vector<8x128xbf16>, vector<128x128xbf16>, vector<8x128xf32> -> vector<8x128xf32>
    %c0_11 = arith.constant 0 : index
    %c0_12 = arith.constant 0 : index
    %17 = vector.load %arg5[%c0_11, %c0_12] : memref<1x128xf32, #tpu.memory_space<vmem>>, vector<1x128xf32>
    %18 = vector.broadcast %17 : vector<1x128xf32> to vector<8x128xf32>
    %19 = arith.addf %16, %18 : vector<8x128xf32>
    %cst_13 = arith.constant 5.000000e-01 : f32
    %20 = vector.broadcast %cst_13 : f32 to vector<8x128xf32>
    %21 = arith.mulf %20, %19 : vector<8x128xf32>
    %22 = math.tanh %21 : vector<8x128xf32>
    %cst_14 = arith.constant 5.000000e-01 : f32
    %23 = vector.broadcast %cst_14 : f32 to vector<8x128xf32>
    %24 = arith.mulf %23, %22 : vector<8x128xf32>
    %cst_15 = arith.constant 5.000000e-01 : f32
    %25 = vector.broadcast %cst_15 : f32 to vector<8x128xf32>
    %26 = arith.addf %24, %25 : vector<8x128xf32>
    %27 = arith.truncf %26 : vector<8x128xf32> to vector<8x128xbf16>
    %c0_16 = arith.constant 0 : index
    %c0_17 = arith.constant 0 : index
    %28 = vector.load %arg6[%c0_16, %c0_17] : memref<128x128xbf16, #tpu.memory_space<vmem>>, vector<128x128xbf16>
    %cst_18 = arith.constant dense<0.000000e+00> : vector<8x128xf32>
    %29 = tpu.matmul %27, %28, %cst_18 {dimension_numbers = #tpu.dot_dimension_numbers<[1], [0], [0], [1], [0, 0, 1, 1], [], []>} : vector<8x128xbf16>, vector<128x128xbf16>, vector<8x128xf32> -> vector<8x128xf32>
    %c0_19 = arith.constant 0 : index
    %c0_20 = arith.constant 0 : index
    %30 = vector.load %arg7[%c0_19, %c0_20] : memref<1x128xf32, #tpu.memory_space<vmem>>, vector<1x128xf32>
    %31 = vector.broadcast %30 : vector<1x128xf32> to vector<8x128xf32>
    %32 = arith.addf %29, %31 : vector<8x128xf32>
    %cst_21 = arith.constant 5.000000e-01 : f32
    %33 = vector.broadcast %cst_21 : f32 to vector<8x128xf32>
    %34 = arith.mulf %33, %32 : vector<8x128xf32>
    %35 = math.tanh %34 : vector<8x128xf32>
    %cst_22 = arith.constant 5.000000e-01 : f32
    %36 = vector.broadcast %cst_22 : f32 to vector<8x128xf32>
    %37 = arith.mulf %36, %35 : vector<8x128xf32>
    %cst_23 = arith.constant 5.000000e-01 : f32
    %38 = vector.broadcast %cst_23 : f32 to vector<8x128xf32>
    %39 = arith.addf %37, %38 : vector<8x128xf32>
    %40 = arith.truncf %39 : vector<8x128xf32> to vector<8x128xbf16>
    %c0_24 = arith.constant 0 : index
    %c0_25 = arith.constant 0 : index
    %41 = vector.load %arg8[%c0_24, %c0_25] : memref<128x128xbf16, #tpu.memory_space<vmem>>, vector<128x128xbf16>
    %cst_26 = arith.constant dense<0.000000e+00> : vector<8x128xf32>
    %42 = tpu.matmul %40, %41, %cst_26 {dimension_numbers = #tpu.dot_dimension_numbers<[1], [0], [0], [1], [0, 0, 1, 1], [], []>} : vector<8x128xbf16>, vector<128x128xbf16>, vector<8x128xf32> -> vector<8x128xf32>
    %c0_27 = arith.constant 0 : index
    %c0_28 = arith.constant 0 : index
    %43 = vector.load %arg9[%c0_27, %c0_28] : memref<1x128xf32, #tpu.memory_space<vmem>>, vector<1x128xf32>
    %44 = vector.broadcast %43 : vector<1x128xf32> to vector<8x128xf32>
    %45 = arith.addf %42, %44 : vector<8x128xf32>
    %cst_29 = arith.constant 5.000000e-01 : f32
    %46 = vector.broadcast %cst_29 : f32 to vector<8x128xf32>
    %47 = arith.mulf %46, %45 : vector<8x128xf32>
    %48 = math.tanh %47 : vector<8x128xf32>
    %cst_30 = arith.constant 5.000000e-01 : f32
    %49 = vector.broadcast %cst_30 : f32 to vector<8x128xf32>
    %50 = arith.mulf %49, %48 : vector<8x128xf32>
    %cst_31 = arith.constant 5.000000e-01 : f32
    %51 = vector.broadcast %cst_31 : f32 to vector<8x128xf32>
    %52 = arith.addf %50, %51 : vector<8x128xf32>
    %53 = vector.extract_strided_slice %52 {offsets = [0, 0], sizes = [8, 1], strides = [1, 1]} : vector<8x128xf32> to vector<8x1xf32>
    %c0_32 = arith.constant 0 : index
    %c0_33 = arith.constant 0 : index
    %54 = vector.load %arg10[%c0_32, %c0_33] : memref<8x1xf32, #tpu.memory_space<vmem>>, vector<8x1xf32>
    tpu.vector_store %arg10[%c0_32, %c0_33], %53 {strides = array<i32>} : memref<8x1xf32, #tpu.memory_space<vmem>>, vector<8x1xf32>,
    return
  }
  func.func @transform_0(%arg0: i32) -> (i32, i32) {
    %c0_i32 = arith.constant 0 : i32
    %c0_i32_0 = arith.constant 0 : i32
    return %arg0, %c0_i32 : i32, i32
  }
  func.func @transform_1(%arg0: i32) -> (i32, i32) {
    %c0_i32 = arith.constant 0 : i32
    %c0_i32_0 = arith.constant 0 : i32
    %c0_i32_1 = arith.constant 0 : i32
    return %c0_i32, %c0_i32_0 : i32, i32
  }
  func.func @transform_2(%arg0: i32) -> (i32, i32) {
    %c0_i32 = arith.constant 0 : i32
    %c0_i32_0 = arith.constant 0 : i32
    %c0_i32_1 = arith.constant 0 : i32
    return %c0_i32, %c0_i32_0 : i32, i32
  }
  func.func @transform_3(%arg0: i32) -> (i32, i32) {
    %c0_i32 = arith.constant 0 : i32
    %c0_i32_0 = arith.constant 0 : i32
    %c0_i32_1 = arith.constant 0 : i32
    return %c0_i32, %c0_i32_0 : i32, i32
  }
  func.func @transform_4(%arg0: i32) -> (i32, i32) {
    %c0_i32 = arith.constant 0 : i32
    %c0_i32_0 = arith.constant 0 : i32
    %c0_i32_1 = arith.constant 0 : i32
    return %c0_i32, %c0_i32_0 : i32, i32
  }
  func.func @transform_5(%arg0: i32) -> (i32, i32) {
    %c0_i32 = arith.constant 0 : i32
    %c0_i32_0 = arith.constant 0 : i32
    %c0_i32_1 = arith.constant 0 : i32
    return %c0_i32, %c0_i32_0 : i32, i32
  }
  func.func @transform_6(%arg0: i32) -> (i32, i32) {
    %c0_i32 = arith.constant 0 : i32
    %c0_i32_0 = arith.constant 0 : i32
    %c0_i32_1 = arith.constant 0 : i32
    return %c0_i32, %c0_i32_0 : i32, i32
  }
  func.func @transform_7(%arg0: i32) -> (i32, i32) {
    %c0_i32 = arith.constant 0 : i32
    %c0_i32_0 = arith.constant 0 : i32
    %c0_i32_1 = arith.constant 0 : i32
    return %c0_i32, %c0_i32_0 : i32, i32
  }
  func.func @transform_8(%arg0: i32) -> (i32, i32) {
    %c0_i32 = arith.constant 0 : i32
    %c0_i32_0 = arith.constant 0 : i32
    %c0_i32_1 = arith.constant 0 : i32
    return %c0_i32, %c0_i32_0 : i32, i32
  }
  func.func @transform_9(%arg0: i32) -> (i32, i32) {
    %c0_i32 = arith.constant 0 : i32
    %c0_i32_0 = arith.constant 0 : i32
    return %arg0, %c0_i32 : i32, i32
  }
}

</mosaic_0001>

<bundles_post_ra>
// kernel: tpu_custom_call.1
= control target key start
LH: loop header
LB: loop body
LE: loop exit
PB: predicated region body
PF: predicated region fallthrough
CT: control target
= control target key end

     0   :  { %14 = vsyncpa [#allocation3], 0  ;;  %s1240_s0 = inlined_call_operand.hbm [shape: f32[8,300], index: 0, kind: input, shape index: {}]   ;;  %s1241_s1 = inlined_call_operand.hbm [shape: bf16[300,128], index: 1, kind: input, shape index: {}]   ;;  %s1242_s2 = inlined_call_operand.vmem [shape: f32[1,128], index: 2, kind: input, shape index: {}]   ;;  %s1243_s3 = inlined_call_operand.hbm [shape: bf16[128,128], index: 3, kind: input, shape index: {}]   ;;  %s1244_s4 = inlined_call_operand.vmem [shape: f32[1,128], index: 4, kind: input, shape index: {}]   ;;  %s1245_s5 = inlined_call_operand.hbm [shape: bf16[128,128], index: 5, kind: input, shape index: {}]   ;;  %s1246_s6 = inlined_call_operand.vmem [shape: f32[1,128], index: 6, kind: input, shape index: {}]   ;;  %s1247_s7 = inlined_call_operand.hbm [shape: bf16[128,128], index: 7, kind: input, shape index: {}]   ;;  %s1248_s8 = inlined_call_operand.vmem [shape: f32[1,128], index: 8, kind: input, shape index: {}]   ;;  %s1249_s9 = inlined_call_operand.vmem [shape: f32[8,1], index: 9, kind: output, shape index: {}]  }
   0x1   :  { %15 = vsyncpa [#allocation5], 0 }
   0x2   :  { %16 = vsyncpa [#allocation8], 0  ;;  %s1059_s30 = smov [#allocation4]   ;;  %s943_s13 = scalar_lea.hbm %s1241_s1, 2432 }
   0x3   :  { %s32_s10 = sshll.u32 %s1059_s30, 4  ;;  %p944_p0 = scmp.ne.s32.totalorder %s1241_s1, %s943_s13  ;;  %s33_s10 = int_to_ptr.vmem [resolvable:$true] %s32_s10 }
   0x4   :  { %p947_p1 = scmp.lt.u32.totalorder %s943_s13, %s1241_s1 }
   0x6   :  { %p949_p2 = pnand %p947_p1, %p944_p0 }
   0x8   :  { %952 = shalt.err (!%p949_p2)
}
   0x9   :  { %s953_s18 = scalar_lea.vmem %s33_s10, 2432  ;;  %p958_p4 = scmp.lt.s32.totalorder %s33_s10, %s33_s10 }
   0xa   :  { %p954_p3 = scmp.ne.s32.totalorder %s33_s10, %s953_s18  ;;  %p959_p5 = scmp.lt.s32.totalorder %s953_s18, %s953_s18 }
   0xc   :  { %p960_p6 = por %p959_p5, %p958_p4 }
   0xe   :  { %p961_p7 = pnand %p960_p6, %p954_p3 }
  0x10   :  { %964 = shalt.err (!%p961_p7)
}
  0x11   :  { %s1060_s19 = smov 64   ;;  %s1061_s20 = smov 4  }
  0x12   :  { %38 = dma.hbm_to_vmem [thread:$0]  %s1241_s1, 2432, %s33_s10, [#allocation5], %s1060_s19, %s1060_s19, %s1061_s20  }
  0x13   :  { %s1062_s23 = smov [#allocation7]   ;;  %s1063_s25 = smov [#allocation2]  }
  0x14   :  { %s60_s24 = sshll.u32 %s1062_s23, 4  ;;  %s23_s26 = sshll.u32 %s1063_s25, 4  ;;  %s61_s24 = int_to_ptr.vmem [resolvable:$true] %s60_s24  ;;  %s24_s26 = int_to_ptr.vmem [resolvable:$true] %s23_s26 }
  0x15   :  { %s965_s29 = scalar_lea.hbm %s1245_s5, 1024 }
  0x16   :  { %p966_p8 = scmp.ne.s32.totalorder %s1245_s5, %s965_s29  ;;  %p969_p9 = scmp.lt.u32.totalorder %s965_s29, %s1245_s5 }
  0x18   :  { %p971_p10 = pnand %p969_p9, %p966_p8 }
  0x1a   :  { %974 = shalt.err (!%p971_p10)
}
  0x1b   :  { %s975_s1 = scalar_lea.vmem %s61_s24, 1024  ;;  %p980_p12 = scmp.lt.s32.totalorder %s61_s24, %s61_s24 }
  0x1c   :  { %p976_p11 = scmp.ne.s32.totalorder %s61_s24, %s975_s1  ;;  %p981_p13 = scmp.lt.s32.totalorder %s975_s1, %s975_s1 }
  0x1e   :  { %p982_p0 = por %p981_p13, %p980_p12 }
  0x20   :  { %p983_p1 = pnand %p982_p0, %p976_p11 }
  0x22   :  { %986 = shalt.err (!%p983_p1)
}
  0x23   :  { %66 = dma.hbm_to_vmem [thread:$0]  %s1245_s5, 1024, %s61_s24, [#allocation8], %s1060_s19, %s1060_s19, %s1061_s20  }
  0x24   :  { %s987_s17 = scalar_lea.hbm %s1240_s0, 384 }
  0x25   :  { %p988_p2 = scmp.ne.s32.totalorder %s1240_s0, %s987_s17  ;;  %p991_p3 = scmp.lt.u32.totalorder %s987_s17, %s1240_s0 }
  0x27   :  { %p993_p4 = pnand %p991_p3, %p988_p2 }
  0x29   :  { %996 = shalt.err (!%p993_p4)
}
  0x2a   :  { %s997_s25 = scalar_lea.vmem %s24_s26, 384  ;;  %p1002_p6 = scmp.lt.s32.totalorder %s24_s26, %s24_s26 }
  0x2b   :  { %p998_p5 = scmp.ne.s32.totalorder %s24_s26, %s997_s25  ;;  %p1003_p7 = scmp.lt.s32.totalorder %s997_s25, %s997_s25 }
  0x2d   :  { %p1004_p8 = por %p1003_p7, %p1002_p6 }
  0x2f   :  { %p1005_p9 = pnand %p1004_p8, %p998_p5 }
  0x31   :  { %1008 = shalt.err (!%p1005_p9)
}
  0x32   :  { %26 = dma.hbm_to_vmem [thread:$0]  %s1240_s0, 384, %s24_s26, [#allocation3]  }
  0x33   :  { %s1064_s27 = smov [#allocation6]   ;;  %s1065_s29 = smov [#allocation9]  }
  0x34   :  { %s46_s28 = sshll.u32 %s1064_s27, 4  ;;  %s74_s30 = sshll.u32 %s1065_s29, 4  ;;  %s47_s28 = int_to_ptr.vmem [resolvable:$true] %s46_s28  ;;  %s75_s30 = int_to_ptr.vmem [resolvable:$true] %s74_s30 }
  0x35   :  { %s1009_s13 = scalar_lea.hbm %s1243_s3, 1024 }
  0x36   :  { %p1010_p10 = scmp.ne.s32.totalorder %s1243_s3, %s1009_s13  ;;  %p1013_p11 = scmp.lt.u32.totalorder %s1009_s13, %s1243_s3 }
  0x38   :  { %p1015_p12 = pnand %p1013_p11, %p1010_p10 }
  0x3a   :  { %1018 = shalt.err (!%p1015_p12)
}
  0x3b   :  { %s1019_s0 = scalar_lea.vmem %s47_s28, 1024  ;;  %p1024_p0 = scmp.lt.s32.totalorder %s47_s28, %s47_s28 }
  0x3c   :  { %p1020_p13 = scmp.ne.s32.totalorder %s47_s28, %s1019_s0  ;;  %p1025_p1 = scmp.lt.s32.totalorder %s1019_s0, %s1019_s0 }
  0x3e   :  { %p1026_p2 = por %p1025_p1, %p1024_p0 }
  0x40   :  { %p1027_p3 = pnand %p1026_p2, %p1020_p13 }
  0x42   :  { %1030 = shalt.err (!%p1027_p3)
}
  0x43   :  { %52 = dma.hbm_to_vmem [thread:$0]  %s1243_s3, 1024, %s47_s28, [#allocation5], %s1060_s19, %s1060_s19, %s1061_s20  }
  0x44   :  { %s1031_s21 = scalar_lea.hbm %s1247_s7, 1024 }
  0x45   :  { %p1032_p4 = scmp.ne.s32.totalorder %s1247_s7, %s1031_s21  ;;  %p1035_p5 = scmp.lt.u32.totalorder %s1031_s21, %s1247_s7 }
  0x47   :  { %p1037_p6 = pnand %p1035_p5, %p1032_p4 }
  0x49   :  { %1040 = shalt.err (!%p1037_p6)
}
  0x4a   :  { %s1041_s24 = scalar_lea.vmem %s75_s30, 1024  ;;  %p1046_p8 = scmp.lt.s32.totalorder %s75_s30, %s75_s30 }
  0x4b   :  { %p1042_p7 = scmp.ne.s32.totalorder %s75_s30, %s1041_s24  ;;  %p1047_p9 = scmp.lt.s32.totalorder %s1041_s24, %s1041_s24 }
  0x4d   :  { %p1048_p10 = por %p1047_p9, %p1046_p8 }
  0x4f   :  { %p1049_p11 = pnand %p1048_p10, %p1042_p7 }
  0x51   :  { %1052 = shalt.err (!%p1049_p11)
}
  0x52   :  { %80 = dma.hbm_to_vmem [thread:$0]  %s1247_s7, 1024, %s75_s30, [#allocation8], %s1060_s19, %s1060_s19, %s1061_s20  }
  0x53   :  { %1053 = dma.done.wait [#allocation3], 384  }
  0x54   :  { %1054 = vsyncadd [#allocation3], 4294966912 }
  0x55   :  { %1055 = dma.done.wait [#allocation5], 3456  }
  0x56   :  { %1056 = vsyncadd [#allocation5], 4294963840 }
  0x57   :  { %1057 = dma.done.wait [#allocation8], 2048  }
  0x58   :  { %1058 = vsyncadd [#allocation8], 4294965248  ;;  %v1066_v0 = vmov 0.0   ;;  %vm1067_vm0 = vmmov 0   ;;  %v892_v1 = vld [vmem:[#allocation4 + $0x40] sm:$0xff]   ;;  %v894_v3 = vld [vmem:[#allocation4 + $0x48] sm:$0xff]  }
  0x59   :  { %813 = vmatprep.subr.bf16.mxu1 %v1066_v0  ;;  %819 = vmatprep.mubr.msk.bf16.mxu1 %vm1067_vm0, %v1066_v0  ;;  %v893_v2 = vld [vmem:[#allocation4] sm:$0xff]   ;;  %v895_v4 = vld [vmem:[#allocation4 + $0x8] sm:$0xff]   ;;  %v896_v5 = vld [vmem:[#allocation4 + $0x50] sm:$0xff]   ;;  %vm267_vm1 = vcmask 1045504   ;;  %vm263_vm2 = vcmask 359424   ;;  %vm703_vm3 = vcmask 7168  }
  0x5a   :  { %760 = vmatprep.subr.bf16.mxu0 %v892_v1  ;;  %v897_v6 = vld [vmem:[#allocation4 + $0x10] sm:$0xff]   ;;  %v898_v7 = vld [vmem:[#allocation4 + $0x58] sm:$0xff]   ;;  %v900_v9 = vld [vmem:[#allocation4 + $0x60] sm:$0xff]  }
  0x5b   :  { %761 = vmatpush3.bf16.msra.mxu0 %v893_v2  ;;  %v899_v8 = vld [vmem:[#allocation4 + $0x18] sm:$0xff]   ;;  %v904_v10 = vld [vmem:[#allocation4 + $0x80] sm:$0xff]   ;;  %v907_v12 = vld [vmem:[#allocation4 + $0x88] sm:$0xff]  }
  0x5c   :  { %762 = vmatprep.subr.bf16.mxu0 %v894_v3  ;;  %v901_v11 = vld [vmem:[#allocation4 + $0x20] sm:$0xff]   ;;  %814 = vmatpush3.bf16.msra.mxu1 %v904_v10  ;;  %v902_v13 = vld [vmem:[#allocation4 + $0x68] sm:$0xff]   ;;  %v100_v14 = vld [vmem:[#allocation2 + $0x8] sm:$0xff] }
  0x5d   :  { %815 = vmatprep.subr.bf16.mxu1 %v1066_v0  ;;  %v903_v15 = vld [vmem:[#allocation4 + $0x28] sm:$0xff]   ;;  %v103_v16 = vpack.c.bf16 %v100_v14, %v100_v14  ;;  %v910_v17 = vld [vmem:[#allocation4 + $0x90] sm:$0x3f]   ;;  %v101_v18 = vld [vmem:[#allocation2 + $0x10] sm:$0xff] }
  0x5e   :  { %v905_v19 = vld [vmem:[#allocation4 + $0x70] sm:$0xff]   ;;  %v269_v21 = vsel %vm267_vm1, %v910_v17, 0  ;;  %v104_v22 = vpack.c.bf16 %v101_v18, %v101_v18  ;;  %v911_v23 = vld [vmem:[#allocation6] sm:$0xff]   ;;  %v99_v26 = vld [vmem:[#allocation2] sm:$0xff] }
  0x5f   :  { %763 = vmatpush3.bf16.msra.mxu0 %v895_v4  ;;  %v906_v20 = vld [vmem:[#allocation4 + $0x30] sm:$0xff]   ;;  %303 = vmatprep.mubr.bf16.mxu0 %v103_v16  ;;  %v908_v24 = vld [vmem:[#allocation4 + $0x78] sm:$0xff]   ;;  %v102_v27 = vpack.c.bf16 %v99_v26, %v99_v26  ;;  %v912_v28 = vld [vmem:[#allocation6 + $0x8] sm:$0xff]  }
  0x60   :  { %764 = vmatprep.subr.bf16.mxu0 %v896_v5  ;;  %816 = vmatpush3.bf16.msra.mxu1 %v907_v12  ;;  %v909_v25 = vld [vmem:[#allocation4 + $0x38] sm:$0xff]   ;;  %v913_v29 = vld [vmem:[#allocation6 + $0x10] sm:$0xff]   ;;  %v914_v30 = vld [vmem:[#allocation6 + $0x18] sm:$0xff]  }
  0x61   :  { %817 = vmatprep.subr.bf16.mxu1 %v1066_v0  ;;  %v915_v31 = vld [vmem:[#allocation6 + $0x20] sm:$0xff]   ;;  %v916_v32 = vld [vmem:[#allocation6 + $0x28] sm:$0xff]   ;;  %v917_v33 = vld [vmem:[#allocation6 + $0x30] sm:$0xff]  }
  0x62   :  { %v918_v34 = vld [vmem:[#allocation6 + $0x38] sm:$0xff]   ;;  %v919_v35 = vld [vmem:[#allocation7] sm:$0xff]   ;;  %v920_v36 = vld [vmem:[#allocation7 + $0x8] sm:$0xff]  }
  0x63   :  { %765 = vmatpush3.bf16.msra.mxu0 %v897_v6  ;;  %v921_v37 = vld [vmem:[#allocation7 + $0x10] sm:$0xff]   ;;  %v712_v44 = vld [vmem:[%s1242_s2] ss:$0 sm:$0xff]  ;;  %v922_v55 = vld [vmem:[#allocation7 + $0x18] sm:$0xff]  }
  0x64   :  { %766 = vmatprep.subr.bf16.mxu0 %v898_v7  ;;  %818 = vmatpush3.bf16.msra.mxu1 %v269_v21  ;;  %v923_v56 = vld [vmem:[#allocation7 + $0x20] sm:$0xff]   ;;  %v924_v57 = vld [vmem:[#allocation7 + $0x28] sm:$0xff]   ;;  %v925_v58 = vld [vmem:[#allocation7 + $0x30] sm:$0xff]  }
  0x65   :  { %823 = vmatprep.subr.bf16.mxu1 %v1066_v0  ;;  %v926_v59 = vld [vmem:[#allocation7 + $0x38] sm:$0xff]   ;;  %v927_v60 = vld [vmem:[#allocation9] sm:$0xff]   ;;  %v928_v61 = vld [vmem:[#allocation9 + $0x8] sm:$0xff]  }
  0x66   :  { %v929_v62 = vld [vmem:[#allocation9 + $0x10] sm:$0xff]   ;;  %v733_v63 = vld [vmem:[%s1244_s4] ss:$0 sm:$0xff]  ;;  %v931_v12 = vld [vmem:[#allocation9 + $0x20] sm:$0xff]  }
  0x67   :  { %767 = vmatpush3.bf16.msra.mxu0 %v899_v8  ;;  %820 = vmatmul.mubr.msk.bf16.vlgmr.msra.gmra.mrb[0].mxu1 %vm263_vm2, %v104_v22  ;;  %v933_v14 = vld [vmem:[#allocation9 + $0x30] sm:$0xff]   ;;  %v742_v16 = vld [vmem:[%s1246_s6] ss:$0 sm:$0xff] }
  0x68   :  { %768 = vmatprep.subr.bf16.mxu0 %v900_v9  ;;  %824 = vmatpush3.bf16.msra.mxu1 %v911_v23 }
  0x69   :  { %839 = vmatprep.mubr.msk.bf16.mxu1 %vm1067_vm0, %v1066_v0  ;;  %825 = vmatprep.subr.bf16.mxu1 %v1066_v0 }
  0x6b   :  { %769 = vmatpush3.bf16.msra.mxu0 %v901_v11  ;;  %v930_v11 = vld [vmem:[#allocation9 + $0x18] sm:$0xff]  }
  0x6c   :  { %770 = vmatprep.subr.bf16.mxu0 %v902_v13  ;;  %826 = vmatpush3.bf16.msra.mxu1 %v912_v28  ;;  %v932_v13 = vld [vmem:[#allocation9 + $0x28] sm:$0xff]  }
  0x6d   :  { %827 = vmatprep.subr.bf16.mxu1 %v1066_v0 }
  0x6f   :  { %771 = vmatpush3.bf16.msra.mxu0 %v903_v15  ;;  %v934_v15 = vld [vmem:[#allocation9 + $0x38] sm:$0xff]  }
  0x70   :  { %772 = vmatprep.subr.bf16.mxu0 %v905_v19  ;;  %828 = vmatpush3.bf16.msra.mxu1 %v913_v29 }
  0x71   :  { %829 = vmatprep.subr.bf16.mxu1 %v1066_v0 }
  0x73   :  { %773 = vmatpush3.bf16.msra.mxu0 %v906_v20 }
  0x74   :  { %774 = vmatprep.subr.bf16.mxu0 %v908_v24  ;;  %830 = vmatpush3.bf16.msra.mxu1 %v914_v30 }
  0x75   :  { %831 = vmatprep.subr.bf16.mxu1 %v1066_v0 }
  0x77   :  { %775 = vmatpush3.bf16.msra.mxu0 %v909_v25 }
  0x78   :  { %843 = vmatprep.subr.bf16.mxu0 %v1066_v0  ;;  %832 = vmatpush3.bf16.msra.mxu1 %v915_v31 }
  0x79   :  { %833 = vmatprep.subr.bf16.mxu1 %v1066_v0 }
  0x7a   :  { %304 = vmatmul.mubr.bf16.vlgmr.msra.gmra.mrb[0].mxu0 %v102_v27 }
  0x7b   :  { %859 = vmatprep.mubr.msk.bf16.mxu0 %vm1067_vm0, %v1066_v0  ;;  %844 = vmatpush3.bf16.msra.mxu0 %v919_v35 }
  0x7c   :  { %834 = vmatpush3.bf16.msra.mxu1 %v916_v32  ;;  %845 = vmatprep.subr.bf16.mxu0 %v1066_v0 }
  0x7d   :  { %835 = vmatprep.subr.bf16.mxu1 %v1066_v0 }
  0x7f   :  { %846 = vmatpush3.bf16.msra.mxu0 %v920_v36 }
  0x80   :  { %836 = vmatpush3.bf16.msra.mxu1 %v917_v33  ;;  %847 = vmatprep.subr.bf16.mxu0 %v1066_v0 }
  0x81   :  { %837 = vmatprep.subr.bf16.mxu1 %v1066_v0 }
  0x83   :  { %848 = vmatpush3.bf16.msra.mxu0 %v921_v37 }
  0x84   :  { %838 = vmatpush3.bf16.msra.mxu1 %v918_v34  ;;  %849 = vmatprep.subr.bf16.mxu0 %v1066_v0 }
  0x85   :  { %863 = vmatprep.subr.bf16.mxu1 %v1066_v0 }
  0x87   :  { %850 = vmatpush3.bf16.msra.mxu0 %v922_v55 }
  0x88   :  { %851 = vmatprep.subr.bf16.mxu0 %v1066_v0 }
  0x8b   :  { %852 = vmatpush3.bf16.msra.mxu0 %v923_v56 }
  0x8c   :  { %853 = vmatprep.subr.bf16.mxu0 %v1066_v0 }
  0x8f   :  { %854 = vmatpush3.bf16.msra.mxu0 %v924_v57 }
  0x90   :  { %855 = vmatprep.subr.bf16.mxu0 %v1066_v0 }
  0x93   :  { %856 = vmatpush3.bf16.msra.mxu0 %v925_v58 }
  0x94   :  { %857 = vmatprep.subr.bf16.mxu0 %v1066_v0 }
  0x97   :  { %858 = vmatpush3.bf16.msra.mxu0 %v926_v59 }
 0x13a   :  { %v345_v38 = vpop.f32.mrb[0].mxu1 }
 0x13b   :  { %v821_v39 = vpop.f32.mrb[1].mxu1 }
 0x13c   :  { %v348_v40 = vpop.f32.mrb[2].mxu1 }
 0x13d   :  { %v822_v41 = vpop.f32.mrb[3].mxu1 }
 0x14d   :  { %v776_v42 = vpop.f32.mrb[0].mxu0 }
 0x14e   :  { %v777_v43 = vpop.f32.mrb[1].mxu0 }
 0x14f   :  { %v778_v45 = vadd.f32 %v777_v43, %v776_v42  ;;  %v779_v46 = vpop.f32.mrb[2].mxu0 }
 0x150   :  { %v780_v47 = vpop.f32.mrb[3].mxu0 }
 0x151   :  { %v306_v48 = vadd.f32 %v778_v45, %v712_v44 }
 0x153   :  { %v346_v49 = vadd.f32 %v345_v38, %v306_v48 }
 0x155   :  { %v351_v50 = vmul.f32 0.5, %v346_v49 }
 0x157   :  { %935 = vtanh.f32 %v351_v50 }
 0x161   :  { %v936_v51 = vpop.eup %935 }
 0x162   :  { %v353_v52 = vmul.f32 0.5, %v936_v51 }
 0x164   :  { %v354_v53 = vadd.f32 0.5, %v353_v52 }
 0x166   :  { %v355_v54 = vpack.c.bf16 %v354_v53, %v354_v53 }
 0x168   :  { %840 = vmatmul.mubr.bf16.vlgmr.msra.gmra.mrb[4].mxu1 %v355_v54 }
 0x169   :  { %879 = vmatprep.mubr.msk.bf16.mxu1 %vm1067_vm0, %v1066_v0  ;;  %864 = vmatpush3.bf16.msra.mxu1 %v927_v60 }
 0x16a   :  { %865 = vmatprep.subr.bf16.mxu1 %v1066_v0 }
 0x16d   :  { %866 = vmatpush3.bf16.msra.mxu1 %v928_v61 }
 0x16e   :  { %867 = vmatprep.subr.bf16.mxu1 %v1066_v0 }
 0x171   :  { %868 = vmatpush3.bf16.msra.mxu1 %v929_v62 }
 0x172   :  { %869 = vmatprep.subr.bf16.mxu1 %v1066_v0 }
 0x175   :  { %870 = vmatpush3.bf16.msra.mxu1 %v930_v11 }
 0x176   :  { %871 = vmatprep.subr.bf16.mxu1 %v1066_v0 }
 0x179   :  { %872 = vmatpush3.bf16.msra.mxu1 %v931_v12 }
 0x17a   :  { %873 = vmatprep.subr.bf16.mxu1 %v1066_v0 }
 0x17d   :  { %874 = vmatpush3.bf16.msra.mxu1 %v932_v13 }
 0x17e   :  { %875 = vmatprep.subr.bf16.mxu1 %v1066_v0 }
 0x181   :  { %876 = vmatpush3.bf16.msra.mxu1 %v933_v14 }
 0x182   :  { %877 = vmatprep.subr.bf16.mxu1 %v1066_v0  ;;  %v751_v0 = vld [vmem:[%s1248_s8] ss:$0 sm:$0xff] }
 0x185   :  { %878 = vmatpush3.bf16.msra.mxu1 %v934_v15 }
 0x23b   :  { %v461_v1 = vpop.f32.mrb[4].mxu1 }
 0x23c   :  { %v462_v2 = vadd.f32 %v733_v63, %v461_v1  ;;  %v841_v3 = vpop.f32.mrb[5].mxu1 }
 0x23d   :  { %v464_v4 = vpop.f32.mrb[6].mxu1 }
 0x23e   :  { %v467_v5 = vmul.f32 0.5, %v462_v2  ;;  %v842_v6 = vpop.f32.mrb[7].mxu1 }
 0x240   :  { %937 = vtanh.f32 %v467_v5 }
 0x24a   :  { %v938_v7 = vpop.eup %937 }
 0x24b   :  { %v469_v8 = vmul.f32 0.5, %v938_v7 }
 0x24d   :  { %v470_v9 = vadd.f32 0.5, %v469_v8 }
 0x24f   :  { %v471_v10 = vpack.c.bf16 %v470_v9, %v470_v9 }
 0x251   :  { %860 = vmatmul.mubr.bf16.vlgmr.msra.gmra.mrb[4].mxu0 %v471_v10 }
 0x324   :  { %v577_v17 = vpop.f32.mrb[4].mxu0 }
 0x325   :  { %v578_v18 = vadd.f32 %v742_v16, %v577_v17  ;;  %v861_v19 = vpop.f32.mrb[5].mxu0 }
 0x326   :  { %v580_v20 = vpop.f32.mrb[6].mxu0 }
 0x327   :  { %v583_v21 = vmul.f32 0.5, %v578_v18  ;;  %v862_v22 = vpop.f32.mrb[7].mxu0 }
 0x329   :  { %939 = vtanh.f32 %v583_v21 }
 0x333   :  { %v940_v23 = vpop.eup %939 }
 0x334   :  { %v585_v24 = vmul.f32 0.5, %v940_v23 }
 0x336   :  { %v586_v25 = vadd.f32 0.5, %v585_v24 }
 0x338   :  { %v587_v26 = vpack.c.bf16 %v586_v25, %v586_v25 }
 0x33a   :  { %880 = vmatmul.mubr.bf16.vlgmr.msra.gmra.mrb[8].mxu1 %v587_v26 }
 0x40d   :  { %v693_v27 = vpop.f32.mrb[8].mxu1 }
 0x40e   :  { %v694_v28 = vadd.f32 %v751_v0, %v693_v27  ;;  %v881_v29 = vpop.f32.mrb[9].mxu1 }
 0x40f   :  { %v696_v30 = vpop.f32.mrb[10].mxu1 }
 0x410   :  { %v699_v31 = vmul.f32 0.5, %v694_v28  ;;  %v882_v32 = vpop.f32.mrb[11].mxu1 }
 0x412   :  { %941 = vtanh.f32 %v699_v31 }
 0x41c   :  { %v942_v33 = vpop.eup %941 }
 0x41d   :  { %v701_v34 = vmul.f32 0.5, %v942_v33 }
 0x41f   :  { %v702_v35 = vadd.f32 0.5, %v701_v34 }
 0x421   :  { %704 = vst.msk [vmem:[%s1249_s9] sm:$0xff] %vm703_vm3, %v702_v35 }
 0x422   :  { %709 = vsyncpa [#allocation3], 1 }
 0x423   :  { %710 = vsyncpa [#allocation5], 1 }
 0x424   :  { %711 = vsyncpa [#allocation8], 1 }

</bundles_post_ra>
